<compile_context>
chip_gen: v5e
topology: v5e:2x2
jax: 0.10.0
libtpu: 0.0.40
codegen_flags: <defaults>
</compile_context>

<pallas_src>
import functools

import jax
import jax.numpy as jnp
from jax import lax
from jax.experimental import pallas as pl
from jax.experimental.pallas import tpu as pltpu


def _round_up(x, m):
    return (x + m - 1) // m * m


# -----------------------------------------------------------------------------
# Pallas kernel: per tile of frames, the whole PE hot path.
# -----------------------------------------------------------------------------
def _pe_kernel(lm_ref, re_ref, im_ref,
               w_ref, wt_ref, sp_ref, absth_ref, invcnt_ref, bandc_ref,
               out_ref, *, n_valid):
    eps = 1e-10
    ln10 = 2.302585092994046

    # clamp so exp(2*logmag) stays finite in f32 (robustness, review item)
    lm = jnp.minimum(lm_ref[...], 43.0)          # (tn, F)
    two_lm = 2.0 * lm
    power = jnp.exp(two_lm)                      # (tn, F) power spectral density

    # bark-band energy: (tn, F) @ (F, Bkp) -> (tn, Bkp)   [Bkp = 128-padded]
    band_e = jnp.dot(power, w_ref[...], preferred_element_type=jnp.float32)
    # spreading across bark bands: (tn, Bkp) @ (Bkp, Bkp)
    spread_e = jnp.dot(band_e, sp_ref[...], preferred_element_type=jnp.float32)

    # tonality via spectral flatness measure (per frame)
    amean = jnp.mean(power, axis=-1, keepdims=True)              # (tn, 1)
    gmean = jnp.exp(jnp.mean(two_lm, axis=-1, keepdims=True))    # exp(mean(log power))
    sfm_db = 10.0 * jnp.log10(gmean / (amean + eps) + eps)       # (tn, 1)
    alpha = jnp.clip(sfm_db * (-1.0 / 60.0), 0.0, 1.0)           # (tn, 1)

    # per-band masking offset (dB) and threshold
    # offset = alpha*(b+1+14.5) + (1-alpha)*5.5 = 5.5 + alpha*(b+10)
    offset = 5.5 + alpha * bandc_ref[...]                        # (tn, Bkp)
    # 10^(log10(C+eps) - offset/10) == (C+eps) * exp(-offset*ln10/10)
    thresh = (spread_e + eps) * jnp.exp(offset * (-ln10 / 10.0))
    thresh = jnp.maximum(thresh, absth_ref[...])                 # (tn, Bkp)

    # per-band 1/quant-step; scatter back to freqs through the one-hot W^T
    inv_band = lax.rsqrt(6.0 * thresh * invcnt_ref[...])         # (tn, Bkp)
    inv_scale = jnp.dot(inv_band, wt_ref[...],
                        preferred_element_type=jnp.float32)      # (tn, F)

    # fused: log2(a) + log2(b) == log2(a*b)  (a, b >= 1)
    a = 2.0 * jnp.abs(re_ref[...]) * inv_scale + 1.0
    b = 2.0 * jnp.abs(im_ref[...]) * inv_scale + 1.0
    pe = jnp.log2(a * b)                                         # (tn, F)

    per_frame = jnp.sum(pe, axis=-1, keepdims=True)              # (tn, 1)

    # mask out padded frames (padding is static; tile & grid known at trace time)
    tn = per_frame.shape[0]
    frame_idx = (lax.broadcasted_iota(jnp.int32, (tn, 1), 0)
                 + pl.program_id(0) * tn)
    per_frame = jnp.where(frame_idx < n_valid, per_frame, 0.0)

    total = jnp.sum(per_frame, axis=0, keepdims=True)            # (1, 1)
    # lane-dense unmasked store: tile total replicated across 128 lanes
    out_ref[0] = total * jnp.ones((1, 128), jnp.float32)


# -----------------------------------------------------------------------------
# Wrapper: parameter construction (glue) + pallas_call
# -----------------------------------------------------------------------------
class PerceptualEntropyPallas:
    """Deterministic, in-script parameterization of the PE loss."""

    def __init__(self, bark_num, spread_function=None, fs=16000, win_len=512,
                 psd_dict=None, tile_frames=512):
        self.bark_num = bark_num
        self.fs = fs
        self.win_len = win_len
        self.n_freq = win_len // 2 + 1
        self.tile_frames = _round_up(max(8, int(tile_frames)), 8)
        self.bark_pad = _round_up(max(bark_num, 1), 128)

        F = self.n_freq
        bkp = self.bark_pad

        # --- bark-band assignment matrix W (F, Bkp), one-hot per freq bin ---
        freqs = jnp.arange(F, dtype=jnp.float32) * (fs / 2.0 / max(F - 1, 1))
        bark = 13.0 * jnp.arctan(0.00076 * freqs) + 3.5 * jnp.arctan(
            (freqs / 7500.0) ** 2)
        bark_max = float(bark[-1]) + 1e-6
        band = jnp.clip(
            jnp.floor(bark / bark_max * bark_num).astype(jnp.int32),
            0, bark_num - 1)
        w = jax.nn.one_hot(band, bark_num, dtype=jnp.float32)        # (F, Bk)
        self.W = jnp.pad(w, ((0, 0), (0, bkp - bark_num)))           # (F, Bkp)
        self.Wt = self.W.T                                           # (Bkp, F)

        # --- spreading function (Schroeder) in linear power domain ----------
        b = jnp.arange(bark_num, dtype=jnp.float32)
        if spread_function is None:
            dz = b[:, None] - b[None, :]
            s_db = 15.81 + 7.5 * (dz + 0.474) - 17.5 * jnp.sqrt(
                1.0 + (dz + 0.474) ** 2)
            spread = jnp.power(10.0, s_db / 10.0).astype(jnp.float32)
        else:
            spread = jnp.asarray(spread_function, jnp.float32).reshape(
                bark_num, bark_num)
        spread_p = jnp.zeros((bkp, bkp), jnp.float32).at[
            :bark_num, :bark_num].set(spread)
        self.spread_t = spread_p.T                                   # (Bkp, Bkp)

        # --- "psd_dict": absolute threshold per bark band (deterministic) ---
        if psd_dict is None:
            absth = 1e-6 * (b + 1.0)
        else:
            absth = jnp.asarray([float(psd_dict[i]) for i in range(bark_num)],
                                jnp.float32)
        self.abs_thresh = jnp.concatenate(
            [absth, jnp.ones((bkp - bark_num,), jnp.float32)]).reshape(1, bkp)

        # bins per band (padded bands -> cnt 1 so rsqrt stays finite)
        cnt = jnp.maximum(jnp.sum(self.W, axis=0), 1.0)
        self.inv_cnt = (1.0 / cnt).reshape(1, bkp)                   # (1, Bkp)

        # hoisted per-band offset constant (b + 10); 0 on padded bands
        idx = jnp.arange(bkp, dtype=jnp.float32)
        self.band_const = jnp.where(idx < bark_num, idx + 10.0,
                                    0.0).reshape(1, bkp)             # (1, Bkp)

    @functools.partial(jax.jit, static_argnums=0)
    def __call__(self, log_magnitude, real, imag):
        B, T, F = log_magnitude.shape
        assert F == self.n_freq
        N = B * T
        tn = min(self.tile_frames, _round_up(N, 8))
        n_pad = _round_up(N, tn)
        num_tiles = n_pad // tn
        bkp = self.bark_pad

        def to2d(x):
            x = x.reshape(N, F).astype(jnp.float32)
            if n_pad != N:
                x = jnp.pad(x, ((0, n_pad - N), (0, 0)))
            return x

        lm, re, im = to2d(log_magnitude), to2d(real), to2d(imag)

        frame_spec = pl.BlockSpec((tn, F), lambda i: (i, 0))
        const = lambda shape: pl.BlockSpec(shape, lambda i: (0, 0))
        kernel = functools.partial(_pe_kernel, n_valid=N)

        tile_totals = pl.pallas_call(
            kernel,
            out_shape=jax.ShapeDtypeStruct((num_tiles, 1, 128), jnp.float32),
            grid=(num_tiles,),
            in_specs=[
                frame_spec,            # log_magnitude
                frame_spec,            # real
                frame_spec,            # imag
                const((F, bkp)),       # W
                const((bkp, F)),       # W^T
                const((bkp, bkp)),     # spread^T (zero-padded)
                const((1, bkp)),       # abs threshold (1.0 on padded bands)
                const((1, bkp)),       # 1 / bins-per-band
                const((1, bkp)),       # band offset constant (b + 10)
            ],
            out_specs=pl.BlockSpec((1, 1, 128), lambda i: (i, 0, 0)),
            compiler_params=pltpu.CompilerParams(
                dimension_semantics=("parallel",),
                vmem_limit_bytes=32 * 1024 * 1024),
        )(lm, re, im, self.W, self.Wt, self.spread_t,
          self.abs_thresh, self.inv_cnt, self.band_const)

        # mean over real (non-padded) frames -> scalar loss (glue)
        return jnp.sum(tile_totals[:, 0, 0]) / jnp.float32(N)


if __name__ == "__main__":
    # small, module-consistent shapes
    B, T = 2, 8
    bark_num = 8
    fs = 16000
    win_len = 32                      # -> F = 17 freq bins
    F = win_len // 2 + 1

    key = jax.random.PRNGKey(0)
    k1, k2, k3 = jax.random.split(key, 3)
    log_magnitude = 0.5 * jax.random.normal(k1, (B, T, F), jnp.float32)
    real = jax.random.normal(k2, (B, T, F), jnp.float32)
    imag = jax.random.normal(k3, (B, T, F), jnp.float32)

    # TODO(synk): reference forward is a stub (`pass`); semantics reconstructed
    # from the PE-loss paper, so there is no torch ground truth to diff against.
    pe_loss = PerceptualEntropyPallas(bark_num, None, fs, win_len, None,
                                      tile_frames=512)
    out = pe_loss(log_magnitude, real, imag)
    jax.block_until_ready(out)
    assert out.shape == () and jnp.isfinite(out)
    print("KERNEL_OK")
</pallas_src>

<mosaic_0001>
module attributes {stable_mosaic.version = 11 : i64} {
  func.func @_pe_kernel(%arg0: i32, %arg1: memref<16x17xf32, #tpu.memory_space<vmem>>, %arg2: memref<16x17xf32, #tpu.memory_space<vmem>>, %arg3: memref<16x17xf32, #tpu.memory_space<vmem>>, %arg4: memref<17x128xf32, #tpu.memory_space<vmem>>, %arg5: memref<128x17xf32, #tpu.memory_space<vmem>>, %arg6: memref<128x128xf32, #tpu.memory_space<vmem>>, %arg7: memref<1x128xf32, #tpu.memory_space<vmem>>, %arg8: memref<1x128xf32, #tpu.memory_space<vmem>>, %arg9: memref<1x128xf32, #tpu.memory_space<vmem>>, %arg10: memref<1x1x128xf32, #tpu.memory_space<vmem>>) attributes {dimension_semantics = [#tpu.dimension_semantics<parallel>], iteration_bounds = array<i64: 1>, scalar_prefetch = 0 : i64, scratch_operands = 0 : i64, tpu.core_type = #tpu.core_type<tc>, window_params = [{transform_indices = @transform_0, window_bounds = array<i64: 16, 17>}, {transform_indices = @transform_1, window_bounds = array<i64: 16, 17>}, {transform_indices = @transform_2, window_bounds = array<i64: 16, 17>}, {pipeline_mode = #tpu.pipeline_mode<synchronous>, transform_indices = @transform_3, window_bounds = array<i64: 17, 128>}, {pipeline_mode = #tpu.pipeline_mode<synchronous>, transform_indices = @transform_4, window_bounds = array<i64: 128, 17>}, {pipeline_mode = #tpu.pipeline_mode<synchronous>, transform_indices = @transform_5, window_bounds = array<i64: 128, 128>}, {pipeline_mode = #tpu.pipeline_mode<synchronous>, transform_indices = @transform_6, window_bounds = array<i64: 1, 128>}, {pipeline_mode = #tpu.pipeline_mode<synchronous>, transform_indices = @transform_7, window_bounds = array<i64: 1, 128>}, {pipeline_mode = #tpu.pipeline_mode<synchronous>, transform_indices = @transform_8, window_bounds = array<i64: 1, 128>}, {transform_indices = @transform_9, window_bounds = array<i64: 1, 1, 128>}]} {
    %c0 = arith.constant 0 : index
    %c0_0 = arith.constant 0 : index
    %0 = vector.load %arg1[%c0, %c0_0] : memref<16x17xf32, #tpu.memory_space<vmem>>, vector<16x17xf32>
    %cst = arith.constant 4.300000e+01 : f32
    %1 = vector.broadcast %cst : f32 to vector<16x17xf32>
    %2 = arith.minimumf %0, %1 : vector<16x17xf32>
    %cst_1 = arith.constant 2.000000e+00 : f32
    %3 = vector.broadcast %cst_1 : f32 to vector<16x17xf32>
    %4 = arith.mulf %3, %2 : vector<16x17xf32>
    %5 = math.exp %4 : vector<16x17xf32>
    %c0_2 = arith.constant 0 : index
    %c0_3 = arith.constant 0 : index
    %6 = vector.load %arg4[%c0_2, %c0_3] : memref<17x128xf32, #tpu.memory_space<vmem>>, vector<17x128xf32>
    %cst_4 = arith.constant dense<0.000000e+00> : vector<16x128xf32>
    %7 = tpu.matmul %5, %6, %cst_4 {dimension_numbers = #tpu.dot_dimension_numbers<[1], [0], [0], [1], [0, 0, 1, 1], [], []>} : vector<16x17xf32>, vector<17x128xf32>, vector<16x128xf32> -> vector<16x128xf32>
    %c0_5 = arith.constant 0 : index
    %c0_6 = arith.constant 0 : index
    %8 = vector.load %arg6[%c0_5, %c0_6] : memref<128x128xf32, #tpu.memory_space<vmem>>, vector<128x128xf32>
    %cst_7 = arith.constant dense<0.000000e+00> : vector<16x128xf32>
    %9 = tpu.matmul %7, %8, %cst_7 {dimension_numbers = #tpu.dot_dimension_numbers<[1], [0], [0], [1], [0, 0, 1, 1], [], []>} : vector<16x128xf32>, vector<128x128xf32>, vector<16x128xf32> -> vector<16x128xf32>
    %cst_8 = arith.constant dense<0.000000e+00> : vector<16xf32>
    %10 = vector.multi_reduction <add>, %5, %cst_8 [1] : vector<16x17xf32> to vector<16xf32>
    %11 = vector.shape_cast %10 : vector<16xf32> to vector<16x1xf32>
    %cst_9 = arith.constant 1.700000e+01 : f32
    %12 = vector.broadcast %cst_9 : f32 to vector<16x1xf32>
    %13 = arith.divf %11, %12 : vector<16x1xf32>
    %cst_10 = arith.constant dense<0.000000e+00> : vector<16xf32>
    %14 = vector.multi_reduction <add>, %4, %cst_10 [1] : vector<16x17xf32> to vector<16xf32>
    %15 = vector.shape_cast %14 : vector<16xf32> to vector<16x1xf32>
    %cst_11 = arith.constant 1.700000e+01 : f32
    %16 = vector.broadcast %cst_11 : f32 to vector<16x1xf32>
    %17 = arith.divf %15, %16 : vector<16x1xf32>
    %18 = math.exp %17 : vector<16x1xf32>
    %cst_12 = arith.constant 1.000000e-10 : f32
    %19 = vector.broadcast %cst_12 : f32 to vector<16x1xf32>
    %20 = arith.addf %13, %19 : vector<16x1xf32>
    %21 = arith.divf %18, %20 : vector<16x1xf32>
    %cst_13 = arith.constant 1.000000e-10 : f32
    %22 = vector.broadcast %cst_13 : f32 to vector<16x1xf32>
    %23 = arith.addf %21, %22 : vector<16x1xf32>
    %24 = math.log %23 : vector<16x1xf32>
    %cst_14 = arith.constant 0.434294492 : f32
    %25 = vector.broadcast %cst_14 : f32 to vector<16x1xf32>
    %26 = arith.mulf %24, %25 : vector<16x1xf32>
    %cst_15 = arith.constant 1.000000e+01 : f32
    %27 = vector.broadcast %cst_15 : f32 to vector<16x1xf32>
    %28 = arith.mulf %27, %26 : vector<16x1xf32>
    %cst_16 = arith.constant -0.0166666675 : f32
    %29 = vector.broadcast %cst_16 : f32 to vector<16x1xf32>
    %30 = arith.mulf %28, %29 : vector<16x1xf32>
    %cst_17 = arith.constant 0.000000e+00 : f32
    %cst_18 = arith.constant 1.000000e+00 : f32
    %31 = vector.broadcast %cst_17 : f32 to vector<16x1xf32>
    %32 = arith.maximumf %31, %30 : vector<16x1xf32>
    %33 = vector.broadcast %cst_18 : f32 to vector<16x1xf32>
    %34 = arith.minimumf %33, %32 : vector<16x1xf32>
    %c0_19 = arith.constant 0 : index
    %c0_20 = arith.constant 0 : index
    %35 = vector.load %arg9[%c0_19, %c0_20] : memref<1x128xf32, #tpu.memory_space<vmem>>, vector<1x128xf32>
    %36 = vector.broadcast %34 : vector<16x1xf32> to vector<16x128xf32>
    %37 = vector.broadcast %35 : vector<1x128xf32> to vector<16x128xf32>
    %38 = arith.mulf %36, %37 : vector<16x128xf32>
    %cst_21 = arith.constant 5.500000e+00 : f32
    %39 = vector.broadcast %cst_21 : f32 to vector<16x128xf32>
    %40 = arith.addf %39, %38 : vector<16x128xf32>
    %cst_22 = arith.constant 1.000000e-10 : f32
    %41 = vector.broadcast %cst_22 : f32 to vector<16x128xf32>
    %42 = arith.addf %9, %41 : vector<16x128xf32>
    %cst_23 = arith.constant -0.23025851 : f32
    %43 = vector.broadcast %cst_23 : f32 to vector<16x128xf32>
    %44 = arith.mulf %40, %43 : vector<16x128xf32>
    %45 = math.exp %44 : vector<16x128xf32>
    %46 = arith.mulf %42, %45 : vector<16x128xf32>
    %c0_24 = arith.constant 0 : index
    %c0_25 = arith.constant 0 : index
    %47 = vector.load %arg7[%c0_24, %c0_25] : memref<1x128xf32, #tpu.memory_space<vmem>>, vector<1x128xf32>
    %48 = vector.broadcast %47 : vector<1x128xf32> to vector<16x128xf32>
    %49 = arith.maximumf %46, %48 : vector<16x128xf32>
    %cst_26 = arith.constant 6.000000e+00 : f32
    %50 = vector.broadcast %cst_26 : f32 to vector<16x128xf32>
    %51 = arith.mulf %50, %49 : vector<16x128xf32>
    %c0_27 = arith.constant 0 : index
    %c0_28 = arith.constant 0 : index
    %52 = vector.load %arg8[%c0_27, %c0_28] : memref<1x128xf32, #tpu.memory_space<vmem>>, vector<1x128xf32>
    %53 = vector.broadcast %52 : vector<1x128xf32> to vector<16x128xf32>
    %54 = arith.mulf %51, %53 : vector<16x128xf32>
    %55 = math.rsqrt %54 : vector<16x128xf32>
    %c0_29 = arith.constant 0 : index
    %c0_30 = arith.constant 0 : index
    %56 = vector.load %arg5[%c0_29, %c0_30] : memref<128x17xf32, #tpu.memory_space<vmem>>, vector<128x17xf32>
    %cst_31 = arith.constant dense<0.000000e+00> : vector<16x17xf32>
    %57 = tpu.matmul %55, %56, %cst_31 {dimension_numbers = #tpu.dot_dimension_numbers<[1], [0], [0], [1], [0, 0, 1, 1], [], []>} : vector<16x128xf32>, vector<128x17xf32>, vector<16x17xf32> -> vector<16x17xf32>
    %c0_32 = arith.constant 0 : index
    %c0_33 = arith.constant 0 : index
    %58 = vector.load %arg2[%c0_32, %c0_33] : memref<16x17xf32, #tpu.memory_space<vmem>>, vector<16x17xf32>
    %59 = math.absf %58 : vector<16x17xf32>
    %cst_34 = arith.constant 2.000000e+00 : f32
    %60 = vector.broadcast %cst_34 : f32 to vector<16x17xf32>
    %61 = arith.mulf %60, %59 : vector<16x17xf32>
    %62 = arith.mulf %61, %57 : vector<16x17xf32>
    %cst_35 = arith.constant 1.000000e+00 : f32
    %63 = vector.broadcast %cst_35 : f32 to vector<16x17xf32>
    %64 = arith.addf %62, %63 : vector<16x17xf32>
    %c0_36 = arith.constant 0 : index
    %c0_37 = arith.constant 0 : index
    %65 = vector.load %arg3[%c0_36, %c0_37] : memref<16x17xf32, #tpu.memory_space<vmem>>, vector<16x17xf32>
    %66 = math.absf %65 : vector<16x17xf32>
    %cst_38 = arith.constant 2.000000e+00 : f32
    %67 = vector.broadcast %cst_38 : f32 to vector<16x17xf32>
    %68 = arith.mulf %67, %66 : vector<16x17xf32>
    %69 = arith.mulf %68, %57 : vector<16x17xf32>
    %cst_39 = arith.constant 1.000000e+00 : f32
    %70 = vector.broadcast %cst_39 : f32 to vector<16x17xf32>
    %71 = arith.addf %69, %70 : vector<16x17xf32>
    %72 = arith.mulf %64, %71 : vector<16x17xf32>
    %73 = math.log %72 : vector<16x17xf32>
    %cst_40 = arith.constant 2.000000e+00 : f32
    %74 = math.log %cst_40 : f32
    %75 = vector.broadcast %74 : f32 to vector<16x17xf32>
    %76 = arith.divf %73, %75 : vector<16x17xf32>
    %cst_41 = arith.constant dense<0.000000e+00> : vector<16xf32>
    %77 = vector.multi_reduction <add>, %76, %cst_41 [1] : vector<16x17xf32> to vector<16xf32>
    %78 = vector.shape_cast %77 : vector<16xf32> to vector<16x1xf32>
    %79 = tpu.iota {dimensions = array<i32: 0>} : vector<16x1xi32>
    %c16_i32 = arith.constant 16 : i32
    %80 = arith.muli %arg0, %c16_i32 : i32
    %81 = vector.broadcast %80 : i32 to vector<16x1xi32>
    %82 = arith.addi %79, %81 : vector<16x1xi32>
    %c16_i32_42 = arith.constant 16 : i32
    %83 = vector.broadcast %c16_i32_42 : i32 to vector<16x1xi32>
    %84 = arith.cmpi slt, %82, %83 : vector<16x1xi32>
    %cst_43 = arith.constant 0.000000e+00 : f32
    %85 = vector.broadcast %cst_43 : f32 to vector<16x1xf32>
    %86 = arith.select %84, %78, %85 : vector<16x1xi1>, vector<16x1xf32>
    %cst_44 = arith.constant dense<0.000000e+00> : vector<1xf32>
    %87 = vector.multi_reduction <add>, %86, %cst_44 [0] : vector<16x1xf32> to vector<1xf32>
    %88 = vector.shape_cast %87 : vector<1xf32> to vector<1x1xf32>
    %cst_45 = arith.constant 1.000000e+00 : f32
    %89 = vector.broadcast %cst_45 : f32 to vector<1x128xf32>
    %90 = vector.broadcast %88 : vector<1x1xf32> to vector<1x128xf32>
    %91 = arith.mulf %90, %89 : vector<1x128xf32>
    %c0_46 = arith.constant 0 : index
    %c0_47 = arith.constant 0 : index
    %c0_48 = arith.constant 0 : index
    %92 = vector.load %arg10[%c0_46, %c0_47, %c0_48] : memref<1x1x128xf32, #tpu.memory_space<vmem>>, vector<1x1x128xf32>
    %93 = vector.shape_cast %92 : vector<1x1x128xf32> to vector<1x128xf32>
    %94 = vector.shape_cast %91 : vector<1x128xf32> to vector<1x1x128xf32>
    tpu.vector_store %arg10[%c0_46, %c0_47, %c0_48], %94 {strides = array<i32>} : memref<1x1x128xf32, #tpu.memory_space<vmem>>, vector<1x1x128xf32>,
    return
  }
  func.func @transform_0(%arg0: i32) -> (i32, i32) {
    %c0_i32 = arith.constant 0 : i32
    %c0_i32_0 = arith.constant 0 : i32
    return %arg0, %c0_i32 : i32, i32
  }
  func.func @transform_1(%arg0: i32) -> (i32, i32) {
    %c0_i32 = arith.constant 0 : i32
    %c0_i32_0 = arith.constant 0 : i32
    return %arg0, %c0_i32 : i32, i32
  }
  func.func @transform_2(%arg0: i32) -> (i32, i32) {
    %c0_i32 = arith.constant 0 : i32
    %c0_i32_0 = arith.constant 0 : i32
    return %arg0, %c0_i32 : i32, i32
  }
  func.func @transform_3(%arg0: i32) -> (i32, i32) {
    %c0_i32 = arith.constant 0 : i32
    %c0_i32_0 = arith.constant 0 : i32
    %c0_i32_1 = arith.constant 0 : i32
    return %c0_i32, %c0_i32_0 : i32, i32
  }
  func.func @transform_4(%arg0: i32) -> (i32, i32) {
    %c0_i32 = arith.constant 0 : i32
    %c0_i32_0 = arith.constant 0 : i32
    %c0_i32_1 = arith.constant 0 : i32
    return %c0_i32, %c0_i32_0 : i32, i32
  }
  func.func @transform_5(%arg0: i32) -> (i32, i32) {
    %c0_i32 = arith.constant 0 : i32
    %c0_i32_0 = arith.constant 0 : i32
    %c0_i32_1 = arith.constant 0 : i32
    return %c0_i32, %c0_i32_0 : i32, i32
  }
  func.func @transform_6(%arg0: i32) -> (i32, i32) {
    %c0_i32 = arith.constant 0 : i32
    %c0_i32_0 = arith.constant 0 : i32
    %c0_i32_1 = arith.constant 0 : i32
    return %c0_i32, %c0_i32_0 : i32, i32
  }
  func.func @transform_7(%arg0: i32) -> (i32, i32) {
    %c0_i32 = arith.constant 0 : i32
    %c0_i32_0 = arith.constant 0 : i32
    %c0_i32_1 = arith.constant 0 : i32
    return %c0_i32, %c0_i32_0 : i32, i32
  }
  func.func @transform_8(%arg0: i32) -> (i32, i32) {
    %c0_i32 = arith.constant 0 : i32
    %c0_i32_0 = arith.constant 0 : i32
    %c0_i32_1 = arith.constant 0 : i32
    return %c0_i32, %c0_i32_0 : i32, i32
  }
  func.func @transform_9(%arg0: i32) -> (i32, i32, i32) {
    %c0_i32 = arith.constant 0 : i32
    %c0_i32_0 = arith.constant 0 : i32
    %c0_i32_1 = arith.constant 0 : i32
    return %arg0, %c0_i32, %c0_i32_0 : i32, i32, i32
  }
}

</mosaic_0001>

<bundles_post_ra>
// kernel: a_call__.1
= control target key start
LH: loop header
LB: loop body
LE: loop exit
PB: predicated region body
PF: predicated region fallthrough
CT: control target
= control target key end

     0   :  { %14 = vsyncpa [#allocation3], 0  ;;  %s792_s0 = inlined_call_operand.hbm [shape: f32[16,17], index: 0, kind: input, shape index: {}]   ;;  %s793_s1 = inlined_call_operand.hbm [shape: f32[16,17], index: 1, kind: input, shape index: {}]   ;;  %s794_s2 = inlined_call_operand.hbm [shape: f32[16,17], index: 2, kind: input, shape index: {}]   ;;  %s795_s3 = inlined_call_operand.hbm [shape: f32[17,128], index: 3, kind: input, shape index: {}]   ;;  %s796_s4 = inlined_call_operand.hbm [shape: f32[128,17], index: 4, kind: input, shape index: {}]   ;;  %s797_s5 = inlined_call_operand.hbm [shape: f32[128,128], index: 5, kind: input, shape index: {}]   ;;  %s798_s6 = inlined_call_operand.vmem [shape: f32[1,128], index: 6, kind: input, shape index: {}]   ;;  %s799_s7 = inlined_call_operand.vmem [shape: f32[1,128], index: 7, kind: input, shape index: {}]   ;;  %s800_s8 = inlined_call_operand.vmem [shape: f32[1,128], index: 8, kind: input, shape index: {}]   ;;  %s801_s9 = inlined_call_operand.vmem [shape: f32[1,1,128], index: 9, kind: output, shape index: {}]  }
   0x1   :  { %15 = vsyncpa [#allocation5], 0 }
   0x2   :  { %16 = vsyncpa [#allocation8], 0 }
   0x3   :  { %17 = vsyncpa [#allocation11], 0  ;;  %s35_s11 = sshll.u32 %s793_s1, 4  ;;  %s676_s12 = smov [#allocation4]   ;;  %s36_s11 = int_to_ptr.hbm [resolvable:$true] %s35_s11 }
   0x4   :  { %s37_s13 = sshll.u32 %s676_s12, 4  ;;  %s61_s16 = sshll.u32 %s795_s3, 4  ;;  %s38_s13 = int_to_ptr.vmem [resolvable:$true] %s37_s13  ;;  %s62_s16 = int_to_ptr.hbm [resolvable:$true] %s61_s16 }
   0x5   :  { %s677_s17 = smov 128   ;;  %s678_s18 = smov 8  }
   0x6   :  { %43 = dma.hbm_to_vmem [thread:$0]  %s36_s11, 256, %s38_s13, [#allocation5], %s677_s17, %s677_s17, %s678_s18  }
   0x7   :  { %s679_s19 = smov [#allocation7]   ;;  %s22_s1 = sshll.u32 %s792_s0, 4  ;;  %s23_s1 = int_to_ptr.hbm [resolvable:$true] %s22_s1 }
   0x8   :  { %s63_s20 = sshll.u32 %s679_s19, 4  ;;  %s48_s24 = sshll.u32 %s794_s2, 4  ;;  %s64_s20 = int_to_ptr.vmem [resolvable:$true] %s63_s20  ;;  %s49_s24 = int_to_ptr.hbm [resolvable:$true] %s48_s24 }
   0x9   :  { %69 = dma.hbm_to_vmem [thread:$0]  %s62_s16, 384, %s64_s20, [#allocation8], %s677_s17, %s677_s17, %s678_s18  }
   0xa   :  { %s680_s25 = smov [#allocation2]   ;;  %s681_s27 = smov [#allocation6]  }
   0xb   :  { %s24_s26 = sshll.u32 %s680_s25, 4  ;;  %s50_s0 = sshll.u32 %s681_s27, 4  ;;  %s25_s26 = int_to_ptr.vmem [resolvable:$true] %s24_s26  ;;  %s51_s0 = int_to_ptr.vmem [resolvable:$true] %s50_s0 }
   0xc   :  { %30 = dma.hbm_to_vmem [thread:$0]  %s23_s1, 256, %s25_s26, [#allocation3], %s677_s17, %s677_s17, %s678_s18  }
   0xd   :  { %s74_s30 = sshll.u32 %s796_s4, 4  ;;  %s87_s11 = sshll.u32 %s797_s5, 4  ;;  %s75_s30 = int_to_ptr.hbm [resolvable:$true] %s74_s30  ;;  %s88_s11 = int_to_ptr.hbm [resolvable:$true] %s87_s11 }
   0xe   :  { %56 = dma.hbm_to_vmem [thread:$0]  %s49_s24, 256, %s51_s0, [#allocation5], %s677_s17, %s677_s17, %s678_s18  }
   0xf   :  { %s682_s12 = smov [#allocation9]   ;;  %s683_s14 = smov [#allocation10]  }
  0x10   :  { %s76_s13 = sshll.u32 %s682_s12, 4  ;;  %s89_s4 = sshll.u32 %s683_s14, 4  ;;  %s77_s13 = int_to_ptr.vmem [resolvable:$true] %s76_s13  ;;  %s90_s4 = int_to_ptr.vmem [resolvable:$true] %s89_s4 }
  0x11   :  { %82 = dma.hbm_to_vmem [thread:$0]  %s75_s30, 2048, %s77_s13, [#allocation8], %s677_s17, %s677_s17, %s678_s18  }
  0x12   :  { %95 = dma.hbm_to_vmem [thread:$0]  %s88_s11, 2048, %s90_s4, [#allocation11], %s677_s17, %s677_s17, %s678_s18  }
  0x13   :  { %668 = dma.done.wait [#allocation3], 256  }
  0x14   :  { %669 = vsyncadd [#allocation3], 4294967040 }
  0x15   :  { %670 = dma.done.wait [#allocation5], 512  }
  0x16   :  { %671 = vsyncadd [#allocation5], 4294966784 }
  0x17   :  { %672 = dma.done.wait [#allocation8], 2432  }
  0x18   :  { %673 = vsyncadd [#allocation8], 4294964864 }
  0x19   :  { %674 = dma.done.wait [#allocation11], 2048  }
  0x1a   :  { %675 = vsyncadd [#allocation11], 4294965248  ;;  %vm146_vm0 = vcmask 1040384   ;;  %v138_v0 = vld [vmem:[#allocation7 + $0x10] sm:$0x1]  ;;  %v137_v1 = vld [vmem:[#allocation7 + $0x8] sm:$0xff] }
  0x1b   :  { %444 = vmatpush.msk.msra.mxu0 %vm146_vm0, %v138_v0  ;;  %v126_v2 = vld [vmem:[#allocation2] sm:$0xff]  ;;  %v127_v3 = vld [vmem:[#allocation2 + $0x8] sm:$0xff]  ;;  %v136_v5 = vld [vmem:[#allocation7] sm:$0xff]  ;;  %vm139_vm1 = vcmask 138240   ;;  %v684_v33 = vmov 17.0  }
  0x1c   :  { %v188_v4 = vld [vmem:[#allocation10 + $0x78] sm:$0xff]  ;;  %v128_v6 = vmin.f32 %v126_v2, 43.0  ;;  %v129_v7 = vmin.f32 %v127_v3, 43.0  ;;  %v187_v8 = vld [vmem:[#allocation10 + $0x70] sm:$0xff]  ;;  %v186_v9 = vld [vmem:[#allocation10 + $0x68] sm:$0xff] }
  0x1d   :  { %272 = vmatpush.msra.mxu1 %v188_v4  ;;  %447 = vmatpush.msra.mxu3 %v188_v4  ;;  %v185_v12 = vld [vmem:[#allocation10 + $0x60] sm:$0xff]  ;;  %v184_v16 = vld [vmem:[#allocation10 + $0x58] sm:$0xff]  ;;  %v183_v17 = vld [vmem:[#allocation10 + $0x50] sm:$0xff] }
  0x1e   :  { %164 = vmatpush.msra.mxu0 %v137_v1  ;;  %v130_v10 = vmul.f32 2.0, %v128_v6  ;;  %v131_v11 = vmul.f32 2.0, %v129_v7  ;;  %v182_v18 = vld [vmem:[#allocation10 + $0x48] sm:$0xff]  ;;  %v181_v20 = vld [vmem:[#allocation10 + $0x40] sm:$0xff]  ;;  %v180_v23 = vld [vmem:[#allocation10 + $0x38] sm:$0xff] }
  0x1f   :  { %273 = vmatpush.msra.mxu1 %v187_v8  ;;  %448 = vmatpush.msra.mxu3 %v187_v8  ;;  %v179_v25 = vld [vmem:[#allocation10 + $0x30] sm:$0xff]  ;;  %v178_v26 = vld [vmem:[#allocation10 + $0x28] sm:$0xff]  ;;  %v177_v27 = vld [vmem:[#allocation10 + $0x20] sm:$0xff] }
  0x20   :  { %165 = vmatpush.msra.mxu0 %v136_v5  ;;  %v132_v13 = vmul.f32 1.442695, %v130_v10  ;;  %v134_v14 = vmul.f32 1.442695, %v131_v11  ;;  %v207_v15 = vsel %vm139_vm1, %v131_v11, 0.0  ;;  %v204_v19 = vsel %vm139_vm1, %v130_v10, 0.0 }
  0x21   :  { %274 = vmatpush.msra.mxu1 %v186_v9  ;;  %449 = vmatpush.msra.mxu3 %v186_v9  ;;  %v176_v29 = vld [vmem:[#allocation10 + $0x18] sm:$0xff]  ;;  %v175_v30 = vld [vmem:[#allocation10 + $0x10] sm:$0xff]  ;;  %v174_v31 = vld [vmem:[#allocation10 + $0x8] sm:$0xff] }
  0x22   :  { %208 = vadd.xlane.f32.xlu1 %v207_v15  ;;  %492 = vpow2.f32 %v132_v13  ;;  %v173_v32 = vld [vmem:[#allocation10] sm:$0xff]  ;;  %v352_v37 = vld [vmem:[#allocation9 + $0x78] sm:$0xff] }
  0x23   :  { %275 = vmatpush.msra.mxu1 %v185_v12  ;;  %450 = vmatpush.msra.mxu3 %v185_v12  ;;  %494 = vpow2.f32 %v134_v14 }
  0x24   :  { %496 = vrcp.f32 %v684_v33  ;;  %353 = vmatpush.msrb.mxu0 %v352_v37  ;;  %463 = vmatpush.msra.mxu2 %v352_v37  ;;  %v346_v33 = vld [vmem:[#allocation9 + $0x48] sm:$0xff]  ;;  %v344_v37 = vld [vmem:[#allocation9 + $0x38] sm:$0xff] }
  0x25   :  { %276 = vmatpush.msra.mxu1 %v184_v16  ;;  %451 = vmatpush.msra.mxu3 %v184_v16 }
  0x27   :  { %277 = vmatpush.msra.mxu1 %v183_v17  ;;  %452 = vmatpush.msra.mxu3 %v183_v17 }
  0x28   :  { %v493_v21 = vpop.eup %492 }
  0x29   :  { %278 = vmatpush.msra.mxu1 %v182_v18  ;;  %453 = vmatpush.msra.mxu3 %v182_v18  ;;  %v495_v22 = vpop.eup %494  ;;  %v189_v28 = vsel %vm139_vm1, %v493_v21, 0.0 }
  0x2a   :  { %445 = vmatmul.msk.f32.vlgmr.msra.gmra.mxu0 %vm139_vm1, %v493_v21  ;;  %205 = vadd.xlane.f32.xlu1 %v204_v19  ;;  %v192_v24 = vsel %vm139_vm1, %v495_v22, 0.0  ;;  %v497_v35 = vpop.eup %496 }
  0x2b   :  { %279 = vmatpush.msra.mxu1 %v181_v20  ;;  %454 = vmatpush.msra.mxu3 %v181_v20  ;;  %v196_v36 = vmul.f32 17.0, %v497_v35  ;;  %vm200_vm2 = vweird.f32 %v497_v35 }
  0x2c   :  { %193 = vadd.xlane.f32.xlu0 %v192_v24  ;;  %v350_v24 = vld [vmem:[#allocation9 + $0x68] sm:$0xff] }
  0x2d   :  { %280 = vmatpush.msra.mxu1 %v180_v23  ;;  %455 = vmatpush.msra.mxu3 %v180_v23  ;;  %v197_v39 = vsub.f32 1.0, %v196_v36  ;;  %v351_v23 = vld [vmem:[#allocation9 + $0x70] sm:$0xff]  ;;  %v345_v36 = vld [vmem:[#allocation9 + $0x40] sm:$0xff] }
  0x2e   :  { %354 = vmatpush.msrb.mxu0 %v351_v23  ;;  %464 = vmatpush.msra.mxu2 %v351_v23  ;;  %v386_v23 = vld [vmem:[#allocation6] sm:$0xff] }
  0x2f   :  { %281 = vmatpush.msra.mxu1 %v179_v25  ;;  %456 = vmatpush.msra.mxu3 %v179_v25  ;;  %v198_v41 = vmul.f32 %v497_v35, %v197_v39 }
  0x30   :  { %355 = vmatpush.msrb.mxu0 %v350_v24  ;;  %465 = vmatpush.msra.mxu2 %v350_v24 }
  0x31   :  { %282 = vmatpush.msra.mxu1 %v178_v26  ;;  %457 = vmatpush.msra.mxu3 %v178_v26  ;;  %v199_v42 = vadd.f32 %v497_v35, %v198_v41  ;;  %v342_v41 = vld [vmem:[#allocation9 + $0x28] sm:$0xff] }
  0x32   :  { %446 = vmatmul.msk.f32.gmra.mxu0 %vm139_vm1, %v495_v22 }
  0x33   :  { %283 = vmatpush.msra.mxu1 %v177_v27  ;;  %458 = vmatpush.msra.mxu3 %v177_v27  ;;  %v201_v44 = vsel %vm200_vm2, %v497_v35, %v199_v42  ;;  %v349_v27 = vld [vmem:[#allocation9 + $0x60] sm:$0xff] }
  0x34   :  { %190 = vadd.xlane.f32.xlu0 %v189_v28  ;;  %356 = vmatpush.msrb.mxu0 %v349_v27  ;;  %v348_v28 = vld [vmem:[#allocation9 + $0x58] sm:$0xff] }
  0x35   :  { %284 = vmatpush.msra.mxu1 %v176_v29  ;;  %459 = vmatpush.msra.mxu3 %v176_v29 }
  0x36   :  { %466 = vmatpush.msra.mxu2 %v349_v27  ;;  %357 = vmatpush.msrb.mxu0 %v348_v28 }
  0x37   :  { %285 = vmatpush.msra.mxu1 %v175_v30  ;;  %460 = vmatpush.msra.mxu3 %v175_v30 }
  0x38   :  { %467 = vmatpush.msra.mxu2 %v348_v28 }
  0x39   :  { %286 = vmatpush.msra.mxu1 %v174_v31  ;;  %461 = vmatpush.msra.mxu3 %v174_v31  ;;  %v347_v31 = vld [vmem:[#allocation9 + $0x50] sm:$0xff] }
  0x3a   :  { %358 = vmatpush.msrb.mxu0 %v347_v31  ;;  %468 = vmatpush.msra.mxu2 %v347_v31 }
  0x3b   :  { %287 = vmatpush.msra.mxu1 %v173_v32  ;;  %462 = vmatpush.msra.mxu3 %v173_v32  ;;  %v489_v32 = vld [vmem:[%s800_s8] ss:$0 sm:$0xff] }
  0x3c   :  { %359 = vmatpush.msrb.mxu0 %v346_v33  ;;  %469 = vmatpush.msra.mxu2 %v346_v33 }
  0x3e   :  { %360 = vmatpush.msrb.mxu0 %v345_v36  ;;  %470 = vmatpush.msra.mxu2 %v345_v36 }
  0x40   :  { %361 = vmatpush.msrb.mxu0 %v344_v37  ;;  %471 = vmatpush.msra.mxu2 %v344_v37 }
  0x95   :  { %v209_v47 = vpop.xlane.xlu1 %208 }
  0x96   :  { %v211_v3 = vmul.f32 %v209_v47, %v201_v44 }
  0x98   :  { %v214_v6 = vmul.f32 1.442695, %v211_v3 }
  0x9d   :  { %v206_v51 = vpop.xlane.xlu1 %205 }
  0x9e   :  { %v210_v54 = vmul.f32 %v206_v51, %v201_v44 }
  0x9f   :  { %v194_v40 = vpop.xlane.xlu0 %193 }
  0xa0   :  { %v203_v49 = vmul.f32 %v201_v44, %v194_v40  ;;  %v212_v56 = vmul.f32 1.442695, %v210_v54  ;;  %v343_v40 = vld [vmem:[#allocation9 + $0x30] sm:$0xff] }
  0xa1   :  { %362 = vmatpush.msrb.mxu0 %v343_v40  ;;  %472 = vmatpush.msra.mxu2 %v343_v40  ;;  %v387_v40 = vld [vmem:[#allocation6 + $0x8] sm:$0xff] }
  0xa2   :  { %v217_v52 = vadd.f32 1e-10, %v203_v49  ;;  %v338_v49 = vld [vmem:[#allocation9 + $0x8] sm:$0xff] }
  0xa3   :  { %363 = vmatpush.msrb.mxu0 %v342_v41  ;;  %473 = vmatpush.msra.mxu2 %v342_v41 }
  0xa4   :  { %vm238_vm7 = vweird.f32 %v217_v52  ;;  %v244_v8 = vand.u32 2147483648, %v217_v52  ;;  %v242_v10 = vand.u32 2147483647, %v217_v52 }
  0xa6   :  { %v245_v11 = vor.u32 1.1754944e-38, %v244_v8  ;;  %vm243_vm10 = vcmp.eq.f32.partialorder %v242_v10, 8.507059e+37 }
  0xa7   :  { %v167_v34 = vpop.f32.mrf.mxu0  ;;  %v191_v43 = vpop.xlane.xlu0 %190 }
  0xa8   :  { %288 = vmatmul.f32.vlgmr.msra.gmra.mxu1 %v167_v34  ;;  %v202_v45 = vmul.f32 %v201_v44, %v191_v43  ;;  %v341_v44 = vld [vmem:[#allocation9 + $0x20] sm:$0xff] }
  0xa9   :  { %364 = vmatpush.msrb.mxu0 %v341_v44  ;;  %474 = vmatpush.msra.mxu2 %v341_v44  ;;  %v389_v44 = vand.u32 2147483647, %v387_v40 }
  0xaa   :  { %v216_v46 = vadd.f32 1e-10, %v202_v45  ;;  %v340_v45 = vld [vmem:[#allocation9 + $0x18] sm:$0xff] }
  0xab   :  { %365 = vmatpush.msrb.mxu0 %v340_v45  ;;  %475 = vmatpush.msra.mxu2 %v340_v45 }
  0xac   :  { %498 = vrcp.f32 %v216_v46  ;;  %vm223_vm3 = vweird.f32 %v216_v46  ;;  %v229_v57 = vand.u32 2147483648, %v216_v46  ;;  %v227_v59 = vand.u32 2147483647, %v216_v46 }
  0xad   :  { %500 = vrcp.f32 %v217_v52 }
  0xae   :  { %502 = vpow2.f32 %v212_v56  ;;  %v230_v61 = vor.u32 1.1754944e-38, %v229_v57  ;;  %vm228_vm6 = vcmp.eq.f32.partialorder %v227_v59, 8.507059e+37  ;;  %v490_v56 = vld [vmem:[%s798_s6] ss:$0 sm:$0xff] }
  0xaf   :  { %v170_v38 = vpop.f32.mrf.mxu0  ;;  %504 = vpow2.f32 %v214_v6 }
  0xb0   :  { %291 = vmatmul.f32.vlgmr.msra.gmra.mxu3 %v170_v38 }
  0xb2   :  { %v499_v48 = vpop.eup %498 }
  0xb3   :  { %v219_v50 = vmul.f32 %v499_v48, %v216_v46  ;;  %vm224_vm4 = vweird.f32 %v499_v48  ;;  %v501_v60 = vpop.eup %500 }
  0xb4   :  { %vm225_vm5 = vmor %vm223_vm3, %vm224_vm4  ;;  %v234_v62 = vmul.f32 %v501_v60, %v217_v52  ;;  %v503_v0 = vpop.eup %502  ;;  %vm239_vm8 = vweird.f32 %v501_v60 }
  0xb5   :  { %v220_v53 = vsub.f32 1.0, %v219_v50  ;;  %vm240_vm9 = vmor %vm238_vm7, %vm239_vm8  ;;  %v505_v13 = vpop.eup %504  ;;  %v337_v50 = vld [vmem:[#allocation9] sm:$0xff] }
  0xb6   :  { %v235_v2 = vsub.f32 1.0, %v234_v62 }
  0xb7   :  { %v221_v55 = vmul.f32 %v499_v48, %v220_v53 }
  0xb8   :  { %v236_v5 = vmul.f32 %v501_v60, %v235_v2 }
  0xb9   :  { %v222_v58 = vadd.f32 %v499_v48, %v221_v55 }
  0xba   :  { %v237_v9 = vadd.f32 %v501_v60, %v236_v5 }
  0xbb   :  { %v226_v63 = vsel %vm225_vm5, %v499_v48, %v222_v58  ;;  %v339_v48 = vld [vmem:[#allocation9 + $0x10] sm:$0xff] }
  0xbc   :  { %v231_v1 = vsel %vm228_vm6, %v230_v61, %v226_v63  ;;  %v241_v12 = vsel %vm240_vm9, %v501_v60, %v237_v9  ;;  %366 = vmatpush.msrb.mxu0 %v339_v48  ;;  %476 = vmatpush.msra.mxu2 %v339_v48  ;;  %v491_v60 = vld [vmem:[%s799_s7] ss:$0 sm:$0xff]  ;;  %v391_v48 = vmul.f32 2.0, %v389_v44 }
  0xbd   :  { %v232_v4 = vmul.f32 %v503_v0, %v231_v1  ;;  %v246_v14 = vsel %vm243_vm10, %v245_v11, %v241_v12 }
  0xbe   :  { %v247_v16 = vmul.f32 %v505_v13, %v246_v14  ;;  %367 = vmatpush.msrb.mxu0 %v338_v49  ;;  %477 = vmatpush.msra.mxu2 %v338_v49 }
  0xbf   :  { %v248_v7 = vadd.f32 1e-10, %v232_v4 }
  0xc0   :  { %v249_v18 = vadd.f32 1e-10, %v247_v16  ;;  %368 = vmatpush.msrb.mxu0 %v337_v50  ;;  %478 = vmatpush.msra.mxu2 %v337_v50 }
  0xc1   :  { %506 = vlog2.f32 %v248_v7 }
  0xc2   :  { %508 = vlog2.f32 %v249_v18 }
  0xc7   :  { %v507_v15 = vpop.eup %506 }
  0xc8   :  { %v251_v17 = vmul.f32 0.6931472, %v507_v15  ;;  %v509_v22 = vpop.eup %508 }
  0xc9   :  { %v253_v25 = vmul.f32 0.6931472, %v509_v22  ;;  %v376_v22 = vld [vmem:[#allocation4] sm:$0xff] }
  0xca   :  { %v254_v19 = vmul.f32 0.4342945, %v251_v17  ;;  %v378_v24 = vand.u32 2147483647, %v376_v22 }
  0xcb   :  { %v255_v29 = vmul.f32 0.4342945, %v253_v25  ;;  %v388_v25 = vand.u32 2147483647, %v386_v23 }
  0xcc   :  { %v256_v20 = vmul.f32 10.0, %v254_v19  ;;  %v380_v27 = vmul.f32 2.0, %v378_v24 }
  0xcd   :  { %v257_v34 = vmul.f32 10.0, %v255_v29  ;;  %v390_v28 = vmul.f32 2.0, %v388_v25 }
  0xce   :  { %v258_v21 = vmul.f32 -0.016666668, %v256_v20 }
  0xcf   :  { %v259_v38 = vmul.f32 -0.016666668, %v257_v34 }
  0xd0   :  { %v260_v26 = vmax.f32 %v258_v21, 0.0  ;;  %v685_v21 = vmov 0.6931472  }
  0xd1   :  { %v261_v43 = vmax.f32 %v259_v38, 0.0 }
  0xd2   :  { %v262_v30 = vmin.f32 %v260_v26, 1.0 }
  0xd3   :  { %v263_v47 = vmin.f32 %v261_v43, 1.0 }
  0xd4   :  { %v268_v35 = vmul.f32 %v489_v32, %v262_v30 }
  0xd5   :  { %v269_v51 = vmul.f32 %v489_v32, %v263_v47 }
  0xd6   :  { %v270_v39 = vadd.f32 5.5, %v268_v35 }
  0xd7   :  { %v271_v52 = vadd.f32 5.5, %v269_v51 }
  0xd8   :  { %v295_v42 = vmul.f32 -0.23025851, %v270_v39  ;;  %v377_v39 = vld [vmem:[#allocation4 + $0x8] sm:$0xff] }
  0xd9   :  { %v296_v57 = vmul.f32 -0.23025851, %v271_v52  ;;  %v379_v43 = vand.u32 2147483647, %v377_v39 }
  0xda   :  { %v297_v46 = vmul.f32 1.442695, %v295_v42 }
  0xdb   :  { %v299_v61 = vmul.f32 1.442695, %v296_v57  ;;  %v381_v47 = vmul.f32 2.0, %v379_v43 }
  0xdc   :  { %510 = vpow2.f32 %v297_v46 }
  0xdd   :  { %512 = vpow2.f32 %v299_v61 }
  0xe2   :  { %v511_v53 = vpop.eup %510 }
  0xe3   :  { %v513_v2 = vpop.eup %512 }
 0x125   :  { %v289_v54 = vpop.f32.mrf.mxu1 }
 0x126   :  { %v290_v55 = vadd.f32 1e-10, %v289_v54 }
 0x128   :  { %v301_v58 = vmul.f32 %v511_v53, %v290_v55 }
 0x12a   :  { %v307_v59 = vmax.f32 %v301_v58, %v490_v56 }
 0x12c   :  { %v309_v62 = vmul.f32 6.0, %v307_v59 }
 0x12e   :  { %v315_v63 = vmul.f32 %v491_v60, %v309_v62 }
 0x130   :  { %514 = vrsqrt.f32 %v315_v63  ;;  %vm323_vm12 = vweird.f32 %v315_v63 }
 0x133   :  { %v292_v0 = vpop.f32.mrf.mxu3 }
 0x134   :  { %v293_v1 = vadd.f32 1e-10, %v292_v0 }
 0x136   :  { %v515_v3 = vpop.eup %514  ;;  %v302_v4 = vmul.f32 %v513_v2, %v293_v1 }
 0x137   :  { %v318_v5 = vmul.f32 %v515_v3, %v315_v63  ;;  %vm324_vm11 = vweird.f32 %v515_v3 }
 0x138   :  { %v308_v6 = vmax.f32 %v302_v4, %v490_v56  ;;  %vm325_vm13 = vmor %vm323_vm12, %vm324_vm11 }
 0x139   :  { %v319_v7 = vmul.f32 %v515_v3, %v318_v5 }
 0x13a   :  { %v310_v8 = vmul.f32 6.0, %v308_v6 }
 0x13b   :  { %v320_v9 = vmul.f32 0.5, %v319_v7 }
 0x13c   :  { %v316_v10 = vmul.f32 %v491_v60, %v310_v8 }
 0x13d   :  { %v321_v11 = vsub.f32 1.5, %v320_v9 }
 0x13e   :  { %516 = vrsqrt.f32 %v316_v10  ;;  %vm333_vm15 = vweird.f32 %v316_v10 }
 0x13f   :  { %v322_v12 = vmul.f32 %v515_v3, %v321_v11  ;;  %518 = vrcp.f32 %v685_v21 }
 0x141   :  { %v326_v13 = vsel %vm325_vm13, %v515_v3, %v322_v12 }
 0x142   :  { %369 = vmatmul.f32.vlgmr.msrb.gmra.mxu0 %v326_v13 }
 0x144   :  { %v517_v14 = vpop.eup %516 }
 0x145   :  { %v328_v15 = vmul.f32 %v517_v14, %v316_v10  ;;  %vm334_vm14 = vweird.f32 %v517_v14  ;;  %v519_v26 = vpop.eup %518 }
 0x146   :  { %vm335_vm0 = vmor %vm333_vm15, %vm334_vm14  ;;  %v403_v29 = vmul.f32 0.6931472, %v519_v26  ;;  %vm407_vm2 = vweird.f32 %v519_v26 }
 0x147   :  { %v329_v16 = vmul.f32 %v517_v14, %v328_v15 }
 0x148   :  { %v404_v33 = vsub.f32 1.0, %v403_v29 }
 0x149   :  { %v330_v17 = vmul.f32 0.5, %v329_v16 }
 0x14a   :  { %v405_v37 = vmul.f32 %v519_v26, %v404_v33 }
 0x14b   :  { %v331_v18 = vsub.f32 1.5, %v330_v17 }
 0x14c   :  { %v406_v38 = vadd.f32 %v519_v26, %v405_v37 }
 0x14d   :  { %v332_v19 = vmul.f32 %v517_v14, %v331_v18 }
 0x14e   :  { %v408_v42 = vsel %vm407_vm2, %v519_v26, %v406_v38 }
 0x14f   :  { %v336_v20 = vsel %vm335_vm0, %v517_v14, %v332_v19 }
 0x150   :  { %372 = vmatmul.f32.vlgmr.msra.gmra.mxu2 %v336_v20 }
 0x1bf   :  { %v370_v30 = vpop.f32.mrf.mxu0 }
 0x1c0   :  { %v382_v31 = vmul.f32 %v380_v27, %v370_v30  ;;  %v392_v32 = vmul.f32 %v390_v28, %v370_v30 }
 0x1c2   :  { %v384_v34 = vadd.f32 1.0, %v382_v31  ;;  %v394_v35 = vadd.f32 1.0, %v392_v32 }
 0x1c4   :  { %v396_v36 = vmul.f32 %v394_v35, %v384_v34 }
 0x1c6   :  { %520 = vlog2.f32 %v396_v36 }
 0x1cc   :  { %v521_v41 = vpop.eup %520 }
 0x1cd   :  { %v399_v45 = vmul.f32 0.6931472, %v521_v41 }
 0x1cf   :  { %v409_v46 = vmul.f32 %v408_v42, %v399_v45 }
 0x1d1   :  { %v411_v49 = vsel %vm139_vm1, %v409_v46, 0.0 }
 0x1d2   :  { %412 = vadd.xlane.f32.xlu2 %v411_v49 }
 0x1d3   :  { %v373_v50 = vpop.f32.mrf.mxu2 }
 0x1d4   :  { %v383_v51 = vmul.f32 %v381_v47, %v373_v50  ;;  %v393_v52 = vmul.f32 %v391_v48, %v373_v50 }
 0x1d6   :  { %v385_v53 = vadd.f32 1.0, %v383_v51  ;;  %v395_v54 = vadd.f32 1.0, %v393_v52 }
 0x1d8   :  { %v397_v55 = vmul.f32 %v395_v54, %v385_v53 }
 0x1da   :  { %522 = vlog2.f32 %v397_v55 }
 0x1e0   :  { %v523_v56 = vpop.eup %522 }
 0x1e1   :  { %v401_v57 = vmul.f32 0.6931472, %v523_v56 }
 0x1e3   :  { %v410_v58 = vmul.f32 %v408_v42, %v401_v57 }
 0x1e5   :  { %v414_v59 = vsel %vm139_vm1, %v410_v58, 0.0 }
 0x1e6   :  { %415 = vadd.xlane.f32.xlu2 %v414_v59 }
 0x245   :  { %v413_v60 = vpop.xlane.xlu2 %412 }
 0x259   :  { %v416_v61 = vpop.xlane.xlu2 %415 }
 0x25a   :  { %v428_v62 = vadd.f32 %v416_v61, %v413_v60 }
 0x25c   :  { %v429_v63 = vrot.slane %v428_v62, 4 }
 0x25e   :  { %v430_v0 = vadd.f32 %v429_v63, %v428_v62 }
 0x260   :  { %v431_v1 = vrot.slane %v430_v0, 2 }
 0x262   :  { %v432_v2 = vadd.f32 %v431_v1, %v430_v0 }
 0x264   :  { %v433_v3 = vrot.slane %v432_v2, 1 }
 0x266   :  { %v434_v4 = vadd.f32 %v433_v3, %v432_v2 }
 0x268   :  { %435 = vst [vmem:[%s801_s9] sm:$0x1] %v434_v4 }
 0x269   :  { %440 = vsyncpa [#allocation3], 1 }
 0x26a   :  { %441 = vsyncpa [#allocation5], 1 }
 0x26b   :  { %442 = vsyncpa [#allocation8], 1 }
 0x26c   :  { %443 = vsyncpa [#allocation11], 1 }

</bundles_post_ra>
